<compile_context>
chip_gen: v6e
topology: v6e:2x2x1
jax: 0.10.0
libtpu: 0.0.40
codegen_flags: <defaults>
</compile_context>

<pallas_src>
import jax
import jax.numpy as jnp
from jax.experimental import pallas as pl
from jax.experimental.pallas import tpu as pltpu


def _round_up(x, m):
    return -(-x // m) * m


def _choose_row_tile(m, max_tile=1024):
    """Pick (tile, padded_m): large row tiles, but >=2 grid steps when possible so the
    grid axis can shard across v7x's two TensorCores."""
    mp = _round_up(m, 8)
    if mp <= 8:
        return mp, mp
    tm = min(max_tile, _round_up(mp // 2, 8))
    return tm, _round_up(m, tm)


# --------------------------- ConvTranspose matmul (+bias) ---------------------------

def _matmul_bias_kernel(a_ref, b_ref, bias_ref, o_ref):
    a = a_ref[...].astype(jnp.bfloat16)          # bf16 MXU operands, f32 accumulation
    b = b_ref[...].astype(jnp.bfloat16)
    o_ref[...] = jnp.dot(a, b, preferred_element_type=jnp.float32) + bias_ref[...]


def matmul_bias(a, b, bias):
    """(M, K) @ (K, N) + bias(1, N) -> f32, tiled over rows."""
    m, k = a.shape
    n = b.shape[1]
    tm, mp = _choose_row_tile(m)
    a_p = jnp.pad(a, ((0, mp - m), (0, 0))) if mp != m else a
    out = pl.pallas_call(
        _matmul_bias_kernel,
        out_shape=jax.ShapeDtypeStruct((mp, n), jnp.float32),
        grid=(mp // tm,),
        in_specs=[pl.BlockSpec((tm, k), lambda i: (i, 0)),
                  pl.BlockSpec((k, n), lambda i: (0, 0)),
                  pl.BlockSpec((1, n), lambda i: (0, 0))],
        out_specs=pl.BlockSpec((tm, n), lambda i: (i, 0)),
        compiler_params=pltpu.CompilerParams(dimension_semantics=("parallel",)),
    )(a_p, b.astype(jnp.float32), bias.astype(jnp.float32))
    return out[:m] if mp != m else out


# --------------------------- BN affine + ReLU (elementwise) ---------------------------

def _scale_shift_relu_kernel(x_ref, sc_ref, sh_ref, o_ref):
    o_ref[...] = jnp.maximum(x_ref[...] * sc_ref[...] + sh_ref[...], 0.0)


def scale_shift_relu(x, scale, shift):
    m, c = x.shape
    tm, mp = _choose_row_tile(m)
    x_p = jnp.pad(x, ((0, mp - m), (0, 0))) if mp != m else x
    out = pl.pallas_call(
        _scale_shift_relu_kernel,
        out_shape=jax.ShapeDtypeStruct((mp, c), jnp.float32),
        grid=(mp // tm,),
        in_specs=[pl.BlockSpec((tm, c), lambda i: (i, 0)),
                  pl.BlockSpec((1, c), lambda i: (0, 0)),
                  pl.BlockSpec((1, c), lambda i: (0, 0))],
        out_specs=pl.BlockSpec((tm, c), lambda i: (i, 0)),
        compiler_params=pltpu.CompilerParams(dimension_semantics=("parallel",)),
    )(x_p, scale.reshape(1, c).astype(jnp.float32),
      shift.reshape(1, c).astype(jnp.float32))
    return out[:m] if mp != m else out


# ---------------- fused Conv3x3 (+optional input affine+ReLU) + BN stats ----------------

def _make_conv_kernel(n_in, H, W, WP, out_rows, in_descs, cout, apply_affine):
    """Kernel factory.

    in_descs[t] = (Ht, Wt, stride_t, top_t, left_t): Python ints describing where input t
    lives inside the (H+2) x (W+2) padded conv frame (top/left include the conv pad and
    any F.pad offsets).  Ref order:
      [scale, shift]?  x_0..x_{n-1}  w_0..w_{n-1}  y  psum  psq  | pad_0..pad_{n-1}  acc
    """
    def kernel(*refs):
        i = 0
        if apply_affine:
            sc_ref, sh_ref = refs[0], refs[1]
            i = 2
        x_refs = refs[i:i + n_in]; i += n_in
        w_refs = refs[i:i + n_in]; i += n_in
        y_ref, s_ref, q_ref = refs[i:i + 3]; i += 3
        pad_refs = refs[i:i + n_in]; i += n_in
        acc_ref = refs[i]

        acc_ref[...] = jnp.zeros_like(acc_ref)

        for t in range(n_in):
            Ht, Wt, stride, top, left = in_descs[t]
            xs = pad_refs[t]
            xs[...] = jnp.zeros_like(xs)                 # zero padding frame
            xv = x_refs[t][0]                            # (rows_t, Ct) f32
            if apply_affine and t == 0:                  # previous BN affine + ReLU,
                xv = jnp.maximum(xv * sc_ref[...] + sh_ref[...], 0.0)  # before padding
            # scatter the valid rows into the flattened padded image
            for h in range(Ht):
                dst = (h + top) * WP + left
                xs[dst:dst + Wt, :] = xv[h * stride:h * stride + Wt, :]
            # 9 taps = 9 contiguous row slabs of the padded image -> 9 MXU dots
            for dy in range(3):
                for dx in range(3):
                    k = dy * 3 + dx
                    start = dy * WP + dx
                    a_k = xs[start:start + out_rows, :].astype(jnp.bfloat16)
                    w_k = w_refs[t][k].astype(jnp.bfloat16)          # (Ct, cout)
                    acc_ref[...] += jnp.dot(a_k, w_k,
                                            preferred_element_type=jnp.float32)

        # BatchNorm partial statistics over the *valid* output pixels of this image
        s = jnp.zeros((1, cout), jnp.float32)
        q = jnp.zeros((1, cout), jnp.float32)
        for h in range(H):
            blk = acc_ref[h * WP:h * WP + W, :]
            s = s + jnp.sum(blk, axis=0, keepdims=True)
            q = q + jnp.sum(blk * blk, axis=0, keepdims=True)
        s_ref[0] = s
        q_ref[0] = q
        y_ref[0] = acc_ref[...].astype(y_ref.dtype)      # columns >= W are don't-care
    return kernel


def conv3x3_bn(inputs, weights, H, W, cout, affine=None):
    """3x3 conv (pad=1, stride=1, no bias) over the implicit channel-concat of `inputs`,
    fused with per-image BatchNorm partial sums (and optionally an input affine+ReLU).

    inputs[t]: dict(x=(N, rows_t, Ct) f32, H, W, stride, top, left), where spatial row h
      of that input occupies rows [h*stride, h*stride + W_t).
    weights[t]: (9, Ct, cout) tap-major weights (tap k = 3*dy + dx).
    Returns y=(N, H*(W+2), cout) f32 in a "padded-width" row layout (columns >= W of each
    W+2 row group are don't-care), plus psum, psq = (N, 1, cout) per-image partials.
    """
    n_in = len(inputs)
    N = inputs[0]["x"].shape[0]
    WP = W + 2
    out_rows = H * WP
    scr_rows = _round_up((H + 2) * WP + 2, 8)

    in_descs = [(d["H"], d["W"], d["stride"], d["top"], d["left"]) for d in inputs]
    kernel = _make_conv_kernel(n_in, H, W, WP, out_rows, in_descs, cout,
                               affine is not None)

    in_specs, args = [], []
    if affine is not None:
        for v in affine:
            in_specs.append(pl.BlockSpec((1, cout), lambda n: (0, 0)))
            args.append(v.reshape(1, cout).astype(jnp.float32))
    for d in inputs:
        r, c = d["x"].shape[1], d["x"].shape[2]
        in_specs.append(pl.BlockSpec((1, r, c), lambda n: (n, 0, 0)))
        args.append(d["x"].astype(jnp.float32))
    for w in weights:
        in_specs.append(pl.BlockSpec(w.shape, lambda n: (0, 0, 0)))
        args.append(w.astype(jnp.float32))

    scratch = [pltpu.VMEM((scr_rows, d["x"].shape[2]), jnp.float32) for d in inputs]
    scratch.append(pltpu.VMEM((out_rows, cout), jnp.float32))

    # NOTE: VMEM footprint here is tiny (<1 MiB/step); for real UNet channel counts budget
    # it explicitly and pass vmem_limit_bytes (v7x has only 64 MiB physical VMEM).
    y, s, q = pl.pallas_call(
        kernel,
        out_shape=(jax.ShapeDtypeStruct((N, out_rows, cout), jnp.float32),
                   jax.ShapeDtypeStruct((N, 1, cout), jnp.float32),
                   jax.ShapeDtypeStruct((N, 1, cout), jnp.float32)),
        grid=(N,),
        in_specs=in_specs,
        out_specs=(pl.BlockSpec((1, out_rows, cout), lambda n: (n, 0, 0)),
                   pl.BlockSpec((1, 1, cout), lambda n: (n, 0, 0)),
                   pl.BlockSpec((1, 1, cout), lambda n: (n, 0, 0))),
        scratch_shapes=scratch,
        compiler_params=pltpu.CompilerParams(dimension_semantics=("parallel",)),
    )(*args)
    return y, s, q


def _bn_affine(psum, psq, count, gamma, beta, eps=1e-5):
    s = jnp.sum(psum, axis=0)                          # (1, C)
    q = jnp.sum(psq, axis=0)                           # (1, C)
    mean = s / count
    var = jnp.maximum(q / count - mean * mean, 0.0)    # biased var, clamped >= 0
    scale = gamma.reshape(1, -1) / jnp.sqrt(var + eps)
    shift = beta.reshape(1, -1) - mean * scale
    return scale, shift


# ----------------------------------- module -----------------------------------

def init_params(key, in_channels, out_channels):
    k = jax.random.split(key, 4)
    c_half = in_channels // 2
    return {
        # ConvTranspose2d(in, in//2, k=2, s=2): weight (Cin, Cout, 2, 2), bias (Cout,)
        "up_w": 0.1 * jax.random.normal(k[0], (in_channels, c_half, 2, 2), jnp.float32),
        "up_b": 0.1 * jax.random.normal(k[1], (c_half,), jnp.float32),
        # ConvBlock: Conv3x3(in->out, no bias), BN, ReLU, Conv3x3(out->out, no bias), BN, ReLU
        "conv1_w": 0.1 * jax.random.normal(k[2], (out_channels, in_channels, 3, 3), jnp.float32),
        "bn1_gamma": jnp.ones((out_channels,), jnp.float32),
        "bn1_beta": jnp.zeros((out_channels,), jnp.float32),
        "conv2_w": 0.1 * jax.random.normal(k[3], (out_channels, out_channels, 3, 3), jnp.float32),
        "bn2_gamma": jnp.ones((out_channels,), jnp.float32),
        "bn2_beta": jnp.zeros((out_channels,), jnp.float32),
    }


def unet_upsample_forward(params, x1_nchw, x2_nchw):
    # NCHW -> NHWC (boundary layout glue)
    x1 = jnp.transpose(x1_nchw, (0, 2, 3, 1)).astype(jnp.float32)   # (N, H1, W1, Cin)
    x2 = jnp.transpose(x2_nchw, (0, 2, 3, 1)).astype(jnp.float32)   # (N, H2, W2, C2)
    N, H1, W1, cin = x1.shape
    _, H2, W2, c2 = x2.shape
    c1 = params["up_w"].shape[1]                                     # cin // 2

    # ---- ConvTranspose2d(k=2, s=2) + bias: one Pallas matmul (bias fused in-kernel) ----
    wde = jnp.transpose(params["up_w"], (0, 2, 3, 1)).reshape(cin, 4 * c1)
    bde = jnp.tile(params["up_b"], 4).reshape(1, 4 * c1)
    yde = matmul_bias(x1.reshape(N * H1 * W1, cin), wde, bde)        # (N*H1*W1, 4*c1)
    # 2x2 pixel shuffle (XLA layout glue)
    x1u = yde.reshape(N, H1, W1, 2, 2, c1).transpose(0, 1, 3, 2, 4, 5)
    x1u = x1u.reshape(N, 2 * H1, 2 * W1, c1)
    H1u, W1u = 2 * H1, 2 * W1

    # F.pad amounts, replicating the torch module's diffX/diffY axis quirk
    # (diffX comes from dim 2 (H) but pads W; diffY comes from dim 3 (W) but pads H).
    diffX = H2 - H1u
    diffY = W2 - W1u
    assert H1u + diffY == H2 and W1u + diffX == W2, \
        "spatial mismatch (the reference pad only aligns when diffX == diffY)"

    H, W = H2, W2
    WP = W + 2
    count = float(N * H * W)

    # ---- Conv1 over the *implicit* concat [x2 | x1u] + fused BN1 statistics ----
    w1 = params["conv1_w"]                                            # (cout, c2+c1, 3, 3)
    cout = w1.shape[0]
    w1_taps = jnp.transpose(w1, (2, 3, 1, 0)).reshape(9, c2 + c1, cout)
    in_x2 = dict(x=x2.reshape(N, H2 * W2, c2), H=H2, W=W2, stride=W2, top=1, left=1)
    in_x1 = dict(x=x1u.reshape(N, H1u * W1u, c1), H=H1u, W=W1u, stride=W1u,
                 top=1 + diffY // 2, left=1 + diffX // 2)             # F.pad folded in
    z1, s1, q1 = conv3x3_bn([in_x2, in_x1],
                            [w1_taps[:, :c2, :], w1_taps[:, c2:, :]],
                            H, W, cout)
    scale1, shift1 = _bn_affine(s1, q1, count, params["bn1_gamma"], params["bn1_beta"])

    # ---- Conv2: applies BN1 affine + ReLU to its input on the fly, fused BN2 stats ----
    w2_taps = jnp.transpose(params["conv2_w"], (2, 3, 1, 0)).reshape(9, cout, cout)
    in_z1 = dict(x=z1, H=H, W=W, stride=WP, top=1, left=1)
    z2, s2, q2 = conv3x3_bn([in_z1], [w2_taps], H, W, cout, affine=(scale1, shift1))
    scale2, shift2 = _bn_affine(s2, q2, count, params["bn2_gamma"], params["bn2_beta"])

    # ---- final BN2 affine + ReLU, drop the padded-width columns, back to NCHW ----
    y = scale_shift_relu(z2.reshape(N * H * WP, cout), scale2, shift2)
    y = y.reshape(N, H, WP, cout)[:, :, :W, :]
    return jnp.transpose(y, (0, 3, 1, 2))


if __name__ == "__main__":
    in_channels, out_channels = 8, 8
    key = jax.random.PRNGKey(0)
    k1, k2, kp = jax.random.split(key, 3)

    # x1: decoder feature (N, Cin, H, W); x2: skip connection (N, Cin//2, 2H, 2W)
    x1 = jax.random.normal(k1, (2, in_channels, 8, 8), jnp.float32)
    x2 = jax.random.normal(k2, (2, in_channels // 2, 16, 16), jnp.float32)

    params = init_params(kp, in_channels, out_channels)
    out = unet_upsample_forward(params, x1, x2)
    out = jax.block_until_ready(out)
    assert out.shape == (2, out_channels, 16, 16), out.shape
    assert bool(jnp.all(jnp.isfinite(out)))
    print("KERNEL_OK")
</pallas_src>

<mosaic_0001>
module attributes {stable_mosaic.version = 11 : i64} {
  func.func @_matmul_bias_kernel(%arg0: i32, %arg1: memref<64x8xf32, #tpu.memory_space<vmem>>, %arg2: memref<8x16xf32, #tpu.memory_space<vmem>>, %arg3: memref<1x16xf32, #tpu.memory_space<vmem>>, %arg4: memref<64x16xf32, #tpu.memory_space<vmem>>) attributes {dimension_semantics = [#tpu.dimension_semantics<parallel>], iteration_bounds = array<i64: 2>, scalar_prefetch = 0 : i64, scratch_operands = 0 : i64, tpu.core_type = #tpu.core_type<tc>, window_params = [{transform_indices = @transform_0, window_bounds = array<i64: 64, 8>}, {pipeline_mode = #tpu.pipeline_mode<synchronous>, transform_indices = @transform_1, window_bounds = array<i64: 8, 16>}, {pipeline_mode = #tpu.pipeline_mode<synchronous>, transform_indices = @transform_2, window_bounds = array<i64: 1, 16>}, {transform_indices = @transform_3, window_bounds = array<i64: 64, 16>}]} {
    %c0 = arith.constant 0 : index
    %c0_0 = arith.constant 0 : index
    %0 = vector.load %arg1[%c0, %c0_0] : memref<64x8xf32, #tpu.memory_space<vmem>>, vector<64x8xf32>
    %1 = arith.truncf %0 : vector<64x8xf32> to vector<64x8xbf16>
    %c0_1 = arith.constant 0 : index
    %c0_2 = arith.constant 0 : index
    %2 = vector.load %arg2[%c0_1, %c0_2] : memref<8x16xf32, #tpu.memory_space<vmem>>, vector<8x16xf32>
    %3 = arith.truncf %2 : vector<8x16xf32> to vector<8x16xbf16>
    %cst = arith.constant dense<0.000000e+00> : vector<64x16xf32>
    %4 = tpu.matmul %1, %3, %cst {dimension_numbers = #tpu.dot_dimension_numbers<[1], [0], [0], [1], [0, 0, 1, 1], [], []>} : vector<64x8xbf16>, vector<8x16xbf16>, vector<64x16xf32> -> vector<64x16xf32>
    %c0_3 = arith.constant 0 : index
    %c0_4 = arith.constant 0 : index
    %5 = vector.load %arg3[%c0_3, %c0_4] : memref<1x16xf32, #tpu.memory_space<vmem>>, vector<1x16xf32>
    %6 = vector.broadcast %5 : vector<1x16xf32> to vector<64x16xf32>
    %7 = arith.addf %4, %6 : vector<64x16xf32>
    %c0_5 = arith.constant 0 : index
    %c0_6 = arith.constant 0 : index
    %8 = vector.load %arg4[%c0_5, %c0_6] : memref<64x16xf32, #tpu.memory_space<vmem>>, vector<64x16xf32>
    tpu.vector_store %arg4[%c0_5, %c0_6], %7 {strides = array<i32>} : memref<64x16xf32, #tpu.memory_space<vmem>>, vector<64x16xf32>,
    return
  }
  func.func @transform_0(%arg0: i32) -> (i32, i32) {
    %c0_i32 = arith.constant 0 : i32
    %c0_i32_0 = arith.constant 0 : i32
    return %arg0, %c0_i32 : i32, i32
  }
  func.func @transform_1(%arg0: i32) -> (i32, i32) {
    %c0_i32 = arith.constant 0 : i32
    %c0_i32_0 = arith.constant 0 : i32
    %c0_i32_1 = arith.constant 0 : i32
    return %c0_i32, %c0_i32_0 : i32, i32
  }
  func.func @transform_2(%arg0: i32) -> (i32, i32) {
    %c0_i32 = arith.constant 0 : i32
    %c0_i32_0 = arith.constant 0 : i32
    %c0_i32_1 = arith.constant 0 : i32
    return %c0_i32, %c0_i32_0 : i32, i32
  }
  func.func @transform_3(%arg0: i32) -> (i32, i32) {
    %c0_i32 = arith.constant 0 : i32
    %c0_i32_0 = arith.constant 0 : i32
    return %arg0, %c0_i32 : i32, i32
  }
}

</mosaic_0001>

<bundles_post_ra>
// kernel: tpu_custom_call.1
= control target key start
LH: loop header
LB: loop body
LE: loop exit
PB: predicated region body
PF: predicated region fallthrough
CT: control target
= control target key end

     0   :  { %s414_s12 = smov 0   ;;  %s445_s0 = inlined_call_operand.vmem [shape: f32[128,8], index: 0, kind: input, shape index: {}]   ;;  %s446_s1 = inlined_call_operand.vmem [shape: f32[8,16], index: 1, kind: input, shape index: {}]   ;;  %s447_s2 = inlined_call_operand.vmem [shape: f32[1,16], index: 2, kind: input, shape index: {}]   ;;  %s448_s3 = inlined_call_operand.vmem [shape: f32[128,16], index: 3, kind: output, shape index: {}]  }
   0x1 LB: > { %s343_s13 = sadd.s32 4294967295, %s392_s12   ;;  %p347_p0 = scmp.ge.s32.totalorder %s392_s12, 1  ;;  %s392_s12 = sphi %s414_s12, %s13_s12  }
   0x2   : > { %p138_p1 = scmp.lt.s32.totalorder %s392_s12, 3 }
   0x4   : > { %p139_p2 = pnand %p347_p0, %p138_p1 }
   0x5   : > { %s348_s16 = sshll.u32 (!%p139_p2), %s343_s13, 3 }
   0x6   : > { %142 = sbr.rel (%p139_p2) target bundleno = 221 (0xdd), region = 32  ;;  %p163_p3 = scmp.lt.s32.totalorder (!%p139_p2), %s348_s16, 15 }
   0xb   : > { %v187_v0 = vld [vmem:[%s446_s1] sm:$0xff]  ;;  %vm209_vm0 = vcmask 1043456   ;;  %s450_s16 = smov (!%p163_p3, %s348_s16), 15  ;;  %vm196_vm1 = vcmask 64512   ;;  %vm278_vm2 = vcmask 130048  }
   0xc   : > { %v188_v1 = vpack.c.bf16 %v187_v0, %v187_v0  ;;  %s349_s17 = sshll.u32 %s450_s16, 3  ;;  %v352_v15 = vld [vmem:[%s447_s2] ss:$0 sm:$0xff] }
   0xd   : > { %s166_s20 = scalar_lea.vmem %s445_s0, %s349_s17  ;;  %s172_s25 = scalar_lea.vmem %s448_s3, %s349_s17 }
   0xe   : > { %376 = vmatprep.subr.msk.bf16.mxu0 %vm209_vm0, %v188_v1  ;;  %377 = vmatprep.subr.msk.bf16.mxu1 %vm209_vm0, %v188_v1  ;;  %v211_v2 = vsel %vm209_vm0, %v188_v1, 0  ;;  %v175_v3 = vld [vmem:[%s166_s20] sm:$0xff]  ;;  %v176_v4 = vld [vmem:[%s166_s20 + $0x8] sm:$0xff]  ;;  %v177_v8 = vld [vmem:[%s166_s20 + $0x10] sm:$0xff] }
   0xf   : > { %365 = vmatpush3.bf16.msra.mxu0 %v211_v2  ;;  %375 = vmatpush3.bf16.msra.mxu1 %v211_v2  ;;  %v179_v5 = vld [vmem:[%s166_s20 + $0x20] sm:$0xff]  ;;  %v183_v6 = vpack.c.bf16 %v176_v4, %v175_v3  ;;  %v180_v7 = vld [vmem:[%s166_s20 + $0x28] sm:$0xff]  ;;  %v178_v9 = vld [vmem:[%s166_s20 + $0x18] sm:$0xff] }
  0x10   : > { %v185_v10 = vpack.c.bf16 %v180_v7, %v179_v5  ;;  %v184_v11 = vpack.c.bf16 %v178_v9, %v177_v8  ;;  %v181_v12 = vld [vmem:[%s166_s20 + $0x30] sm:$0xff]  ;;  %v182_v13 = vld [vmem:[%s166_s20 + $0x38] sm:$0xff] }
  0x11   : > { %366 = vmatprep.mubr.msk.bf16.mxu0 %vm196_vm1, %v183_v6  ;;  %v186_v14 = vpack.c.bf16 %v182_v13, %v181_v12 }
  0x12   : > { %370 = vmatprep.mubr.msk.bf16.mxu1 %vm196_vm1, %v185_v10  ;;  %367 = vmatmul.mubr.msk.bf16.vlgmr.msra.gmra.mxu0 %vm196_vm1, %v184_v11 }
  0x13   : > { %371 = vmatmul.mubr.msk.bf16.vlgmr.msra.gmra.mxu1 %vm196_vm1, %v186_v14 }
  0xd2   : > { %v368_v16 = vpop.f32.mrf.mxu0 }
  0xd3   : > { %v256_v17 = vadd.f32 %v368_v16, %v352_v15  ;;  %v372_v18 = vpop.f32.mrf.mxu1 }
  0xd4   : > { %v272_v19 = vadd.f32 %v372_v18, %v352_v15  ;;  %v247_v20 = vpop.f32.mrf.mxu0 }
  0xd5   : > { %281 = vst.msk [vmem:[%s172_s25 + $0x10] sm:$0xff] %vm278_vm2, %v256_v17  ;;  %v248_v21 = vadd.f32 %v352_v15, %v247_v20  ;;  %v263_v22 = vpop.f32.mrf.mxu1 }
  0xd6   : > { %285 = vst.msk [vmem:[%s172_s25 + $0x30] sm:$0xff] %vm278_vm2, %v272_v19  ;;  %v264_v23 = vadd.f32 %v352_v15, %v263_v22  ;;  %v369_v24 = vpop.f32.mrf.mxu0 }
  0xd7   : > { %279 = vst.msk [vmem:[%s172_s25] sm:$0xff] %vm278_vm2, %v248_v21  ;;  %v259_v25 = vadd.f32 %v369_v24, %v352_v15  ;;  %v373_v26 = vpop.f32.mrf.mxu1 }
  0xd8   : > { %283 = vst.msk [vmem:[%s172_s25 + $0x20] sm:$0xff] %vm278_vm2, %v264_v23  ;;  %v275_v27 = vadd.f32 %v373_v26, %v352_v15  ;;  %v250_v28 = vpop.f32.mrf.mxu0 }
  0xd9   : > { %282 = vst.msk [vmem:[%s172_s25 + $0x18] sm:$0xff] %vm278_vm2, %v259_v25  ;;  %v251_v29 = vadd.f32 %v352_v15, %v250_v28  ;;  %v266_v30 = vpop.f32.mrf.mxu1 }
  0xda   : > { %286 = vst.msk [vmem:[%s172_s25 + $0x38] sm:$0xff] %vm278_vm2, %v275_v27  ;;  %v267_v31 = vadd.f32 %v352_v15, %v266_v30 }
  0xdb   : > { %280 = vst.msk [vmem:[%s172_s25 + $0x8] sm:$0xff] %vm278_vm2, %v251_v29 }
  0xdc   : > { %284 = vst.msk [vmem:[%s172_s25 + $0x28] sm:$0xff] %vm278_vm2, %v267_v31 }
  0xdd PF: > { %s13_s12 = sadd.s32 1, %s392_s12  }
  0xde   : > { %p10_p4 = scmp.ge.s32.totalorder %s13_s12, 4  }
  0xe0   :  { %12 = sbr.rel (!%p10_p4) target bundleno = 1 (0x1), region = 62 }

</bundles_post_ra>
